<compile_context>
chip_gen: v5e
topology: v5e:2x2
jax: 0.10.0
libtpu: 0.0.40
codegen_flags: <defaults>
</compile_context>

<pallas_src>
import math

import jax
import jax.numpy as jnp
from jax.experimental import pallas as pl
from jax.experimental.pallas import tpu as pltpu


def _cdiv(a: int, b: int) -> int:
    return -(-a // b)


def _round_up(a: int, b: int) -> int:
    return _cdiv(a, b) * b


def _scale_kernel(x_ref, s_ref, o_ref):
    # x_ref: (tr, tw) tile; s_ref: (1, tw) scale slice; VPU broadcast multiply.
    o_ref[...] = (x_ref[...] * s_ref[...]).astype(o_ref.dtype)


def scale_layer(x: jax.Array, scale: jax.Array, *, tile_budget_bytes: int = 8 * 1024 * 1024) -> jax.Array:
    """Equivalent of ScaleLayer.forward: x * scale broadcast over leading dims."""
    orig_shape = x.shape
    dim = int(scale.shape[-1])
    assert orig_shape[-1] == dim, "last axis of x must equal scale dim"

    out_dtype = jnp.promote_types(x.dtype, scale.dtype)

    rows = int(math.prod(orig_shape[:-1]))  # prod(()) == 1 handles rank-1 x
    if rows == 0 or dim == 0:
        return jnp.zeros(orig_shape, out_dtype)

    x2 = x.reshape(rows, dim)

    # ---- lane-dense fold: make the kernel's last dim a multiple of 128 -------
    k = 1 if dim % 128 == 0 else 128 // math.gcd(dim, 128)
    width = k * dim
    pad = (-rows) % k  # pad only to a multiple of k (often 0)
    if pad:
        x2 = jnp.pad(x2, ((0, pad), (0, 0)))
    padded_rows = rows + pad
    folded_rows = padded_rows // k
    xw = x2.reshape(folded_rows, width)  # pure bitcast reshape
    scale_w = jnp.tile(scale.reshape(1, dim), (1, k)) if k > 1 else scale.reshape(1, dim)

    # ---- tiling policy --------------------------------------------------------
    x_item = jnp.dtype(x.dtype).itemsize
    o_item = jnp.dtype(out_dtype).itemsize
    s_item = jnp.dtype(scale.dtype).itemsize
    pair = x_item + o_item  # in + out bytes per element
    sub = max(8, 32 // min(x_item, o_item))  # sublane multiple: 8 f32, 16 bf16, 32 int8

    # Lane-axis split only when even `sub` rows exceed the tile budget (huge dim).
    if sub * width * pair > tile_budget_bytes:
        tw = max(128, (tile_budget_bytes // (sub * pair)) // 128 * 128)
    else:
        tw = width

    total_bytes = folded_rows * width * pair
    if folded_rows <= sub or total_bytes <= (2 << 20):
        # Tiny input: single row tile whose extent equals the full array dim
        # (legal regardless of sublane divisibility).
        tr = folded_rows
    else:
        tr = max(sub, (tile_budget_bytes // (tw * pair)) // sub * sub)
        # Keep >= ~8 row tiles when possible: pipelining + both v7x cores.
        min_tiles = min(8, folded_rows // sub)
        if min_tiles >= 2:
            tr = min(tr, max(sub, _round_up(_cdiv(folded_rows, min_tiles), sub)))
        if tr >= folded_rows:
            tr = folded_rows
    n_row = _cdiv(folded_rows, tr)
    n_col = _cdiv(width, tw)

    # Enforced VMEM budget: 2 buffers for x tile, out tile and scale slice.
    vmem_need = 2 * tr * tw * pair + 2 * tw * s_item
    vmem_limit = int(min(max(vmem_need + (8 << 20), 32 << 20), 48 << 20))

    cost = pl.CostEstimate(
        flops=rows * dim,
        transcendentals=0,
        bytes_accessed=rows * dim * (x_item + o_item) + dim * s_item,
    )

    out = pl.pallas_call(
        _scale_kernel,
        out_shape=jax.ShapeDtypeStruct((folded_rows, width), out_dtype),
        grid_spec=pltpu.PrefetchScalarGridSpec(
            num_scalar_prefetch=0,
            grid=(n_row, n_col),
            in_specs=[
                pl.BlockSpec((tr, tw), lambda i, j: (i, j)),
                pl.BlockSpec((1, tw), lambda i, j: (0, j)),  # scale: resident when n_col == 1
            ],
            out_specs=pl.BlockSpec((tr, tw), lambda i, j: (i, j)),
        ),
        compiler_params=pltpu.CompilerParams(
            dimension_semantics=("parallel", "parallel"),
            vmem_limit_bytes=vmem_limit,
        ),
        cost_estimate=cost,
    )(xw, scale_w)

    out = out.reshape(padded_rows, dim)
    if pad:
        out = out[:rows]
    return out.reshape(orig_shape)


if __name__ == "__main__":
    key = jax.random.PRNGKey(0)
    k_main, k_b, k_c = jax.random.split(key, 3)

    # Primary test: rank-4 x, last dim == dim (shape consistent with the module).
    dim = 16
    x = jax.random.normal(k_main, (2, 4, 16, dim), dtype=jnp.float32)
    scale = jnp.ones((dim,), jnp.float32) + 0.01 * jnp.arange(dim, dtype=jnp.float32)
    out = scale_layer(x, scale)
    jax.block_until_ready(out)
    ref = x * scale[(None,) * (x.ndim - 1) + (...,)]
    assert out.shape == ref.shape and out.dtype == ref.dtype
    assert jnp.allclose(out, ref, atol=1e-6, rtol=1e-6)

    # Secondary: fold + small row-pad path (dim % 128 != 0, rows % k != 0) with
    # mixed-dtype promotion (bf16 activations * f32 scale -> f32 output).
    dim_b = 24
    xb = jax.random.normal(k_b, (3, 5, dim_b), dtype=jnp.bfloat16)
    sb = jnp.ones((dim_b,), jnp.float32) + 0.02 * jnp.arange(dim_b, dtype=jnp.float32)
    ob = scale_layer(xb, sb)
    jax.block_until_ready(ob)
    rb = xb * sb[(None,) * (xb.ndim - 1) + (...,)]
    assert ob.shape == rb.shape and ob.dtype == rb.dtype
    assert jnp.allclose(ob, rb, atol=1e-6, rtol=1e-6)

    # Tertiary: dim already a multiple of 128 (no fold), small row count.
    dim_c = 256
    xc = jax.random.normal(k_c, (4, 5, dim_c), dtype=jnp.float32)
    sc = jnp.ones((dim_c,), jnp.float32) - 0.001 * jnp.arange(dim_c, dtype=jnp.float32)
    oc = scale_layer(xc, sc)
    jax.block_until_ready(oc)
    rc = xc * sc[(None,) * (xc.ndim - 1) + (...,)]
    assert oc.shape == rc.shape and oc.dtype == rc.dtype
    assert jnp.allclose(oc, rc, atol=1e-6, rtol=1e-6)

    print("KERNEL_OK")
</pallas_src>

<mosaic_0001>
module attributes {stable_mosaic.version = 11 : i64} {
  func.func @_scale_kernel(%arg0: i32, %arg1: i32, %arg2: memref<16x128xf32, #tpu.memory_space<vmem>>, %arg3: memref<1x128xf32, #tpu.memory_space<vmem>>, %arg4: memref<16x128xf32, #tpu.memory_space<vmem>>) attributes {dimension_semantics = [#tpu.dimension_semantics<parallel>, #tpu.dimension_semantics<parallel>], iteration_bounds = array<i64: 1, 1>, scalar_prefetch = 0 : i64, scratch_operands = 0 : i64, tpu.core_type = #tpu.core_type<tc>, window_params = [{transform_indices = @transform_0, window_bounds = array<i64: 16, 128>}, {transform_indices = @transform_1, window_bounds = array<i64: 1, 128>}, {transform_indices = @transform_2, window_bounds = array<i64: 16, 128>}]} {
    %c0 = arith.constant 0 : index
    %c0_0 = arith.constant 0 : index
    %0 = vector.load %arg2[%c0, %c0_0] : memref<16x128xf32, #tpu.memory_space<vmem>>, vector<16x128xf32>
    %c0_1 = arith.constant 0 : index
    %c0_2 = arith.constant 0 : index
    %1 = vector.load %arg3[%c0_1, %c0_2] : memref<1x128xf32, #tpu.memory_space<vmem>>, vector<1x128xf32>
    %2 = vector.broadcast %1 : vector<1x128xf32> to vector<16x128xf32>
    %3 = arith.mulf %0, %2 : vector<16x128xf32>
    %c0_3 = arith.constant 0 : index
    %c0_4 = arith.constant 0 : index
    %4 = vector.load %arg4[%c0_3, %c0_4] : memref<16x128xf32, #tpu.memory_space<vmem>>, vector<16x128xf32>
    tpu.vector_store %arg4[%c0_3, %c0_4], %3 {strides = array<i32>} : memref<16x128xf32, #tpu.memory_space<vmem>>, vector<16x128xf32>,
    return
  }
  func.func @transform_0(%arg0: i32, %arg1: i32) -> (i32, i32) {
    %c0_i32 = arith.constant 0 : i32
    return %arg0, %arg1 : i32, i32
  }
  func.func @transform_1(%arg0: i32, %arg1: i32) -> (i32, i32) {
    %c0_i32 = arith.constant 0 : i32
    %c0_i32_0 = arith.constant 0 : i32
    return %c0_i32, %arg1 : i32, i32
  }
  func.func @transform_2(%arg0: i32, %arg1: i32) -> (i32, i32) {
    %c0_i32 = arith.constant 0 : i32
    return %arg0, %arg1 : i32, i32
  }
}

</mosaic_0001>

<bundles_post_ra>
// kernel: tpu_custom_call.1
= control target key start
LH: loop header
LB: loop body
LE: loop exit
PB: predicated region body
PF: predicated region fallthrough
CT: control target
= control target key end

     0   :  { %7 = vsyncpa [#allocation3], 0  ;;  %s185_s0 = inlined_call_operand.hbm [shape: f32[16,128], index: 0, kind: input, shape index: {}]   ;;  %s186_s1 = inlined_call_operand.hbm [shape: f32[1,128], index: 1, kind: input, shape index: {}]   ;;  %s187_s2 = inlined_call_operand.hbm [shape: f32[16,128], index: 2, kind: output, shape index: {}]  }
   0x1   :  { %8 = vsyncpa [#allocation6], 0 }
   0x2   :  { %9 = vsyncpa [#allocation4], 0  ;;  %s14_s11 = sshll.u32 %s185_s0, 4  ;;  %s156_s12 = smov [#allocation2]   ;;  %s15_s11 = int_to_ptr.hbm [resolvable:$true] %s14_s11 }
   0x3   :  { %s16_s13 = sshll.u32 %s156_s12, 4  ;;  %s28_s16 = sshll.u32 %s186_s1, 4  ;;  %s17_s13 = int_to_ptr.vmem [resolvable:$true] %s16_s13  ;;  %s29_s16 = int_to_ptr.hbm [resolvable:$true] %s28_s16 }
   0x4   :  { %s157_s17 = smov 128   ;;  %s158_s18 = smov 8  }
   0x5   :  { %22 = dma.hbm_to_vmem [thread:$0]  %s15_s11, 256, %s17_s13, [#allocation3], %s157_s17, %s157_s17, %s158_s18  }
   0x6   :  { %s159_s19 = smov [#allocation5]  }
   0x7   :  { %s30_s20 = sshll.u32 %s159_s19, 4  ;;  %s31_s20 = int_to_ptr.vmem [resolvable:$true] %s30_s20 }
   0x8   :  { %33 = dma.hbm_to_vmem [thread:$0]  %s29_s16, 16, %s31_s20, [#allocation6]  }
   0x9   :  { %150 = dma.done.wait [#allocation3], 256  }
   0xa   :  { %151 = vsyncadd [#allocation3], 4294967040 }
   0xb   :  { %152 = dma.done.wait [#allocation6], 16  }
   0xc   :  { %153 = vsyncadd [#allocation6], 4294967280  ;;  %s58_s22 = sshll.u32 %s187_s2, 4  ;;  %v42_v0 = vld [vmem:[#allocation2] sm:$0xff]  ;;  %v77_v1 = vld [vmem:[#allocation5] ss:$0 sm:$0xff]  ;;  %s59_s22 = int_to_ptr.hbm [resolvable:$true] %s58_s22 }
   0xd   :  { %s160_s23 = smov [#allocation7]   ;;  %v43_v2 = vld [vmem:[#allocation2 + $0x8] sm:$0xff]  ;;  %v48_v3 = vmul.f32 %v77_v1, %v42_v0 }
   0xe   :  { %s56_s1 = sshll.u32 %s160_s23, 4  ;;  %v49_v4 = vmul.f32 %v77_v1, %v43_v2  ;;  %s57_s1 = int_to_ptr.vmem [resolvable:$true] %s56_s1 }
   0xf   :  { %50 = vst [vmem:[#allocation7] sm:$0xff] %v48_v3 }
  0x10   :  { %51 = vst [vmem:[#allocation7 + $0x8] sm:$0xff] %v49_v4 }
  0x11   :  { %64 = dma.vmem_to_hbm [thread:$0]  %s57_s1, 256, %s59_s22, [#allocation4], %s157_s17, %s157_s17, %s158_s18  }
  0x12   :  { %154 = dma.done.wait [#allocation4], 256  }
  0x13   :  { %155 = vsyncadd [#allocation4], 4294967040 }
  0x14   :  { %69 = vsyncpa [#allocation3], 1 }
  0x15   :  { %70 = vsyncpa [#allocation6], 1 }
  0x16   :  { %71 = vsyncpa [#allocation4], 1 }

</bundles_post_ra>
